<compile_context>
chip_gen: v6e
topology: v6e:2x2x1
jax: 0.10.0
libtpu: 0.0.40
codegen_flags: <defaults>
</compile_context>

<pallas_src>
import jax
import jax.numpy as jnp
from jax.experimental import pallas as pl
from jax.experimental.pallas import tpu as pltpu


_LANE = 128
_SUBLANE = 8
_LANE_TILE_MAX = 8192            # lanes per block (32 KiB of f32 per sublane row)
_ROW_TILE_MAX = 1024             # sublane rows per block
_TILE_TARGET_BYTES = 4 << 20     # ~4 MiB per image block (near HBM roofline, few grid steps)
_VMEM_LIMIT_BYTES = 48 << 20     # 2 bufs x (in + out) x 4 MiB = 16 MiB << 48 MiB; fits all gens


def _round_up(x, m):
    return (x + m - 1) // m * m


def _normalize_kernel(img_ref, mean_ref, inv_std_ref, out_ref):
    # img block: (row_tile, lane_tile); mean / inv_std: (row_tile, 1) f32 columns
    # broadcast along the lane axis.  Pure element-wise VPU work, hidden under DMA.
    x = (img_ref[...] - mean_ref[...]) * inv_std_ref[...]
    out_ref[...] = x.astype(out_ref.dtype)


def normalize_pallas(img, mean, std):
    """(img - mean.view(-1,1,1)) / std.view(-1,1,1) for CHW or NCHW images."""
    orig_shape = img.shape
    if img.ndim == 3:
        n = 1
        c, h, w = img.shape
    elif img.ndim == 4:
        n, c, h, w = img.shape
    else:
        raise ValueError(f"expected CHW or NCHW image, got shape {img.shape}")

    # Integer images would silently truncate mean/std -> promote to float32.
    if not jnp.issubdtype(img.dtype, jnp.floating):
        img = img.astype(jnp.float32)
    dtype = img.dtype

    # Per-channel stats in float32 (reciprocal taken in f32 regardless of img dtype).
    mean = jnp.asarray(mean, dtype=jnp.float32).reshape(-1)
    std = jnp.asarray(std, dtype=jnp.float32).reshape(-1)
    if mean.shape[0] != c or std.shape[0] != c:
        raise ValueError("mean/std must have one entry per channel")
    inv_std = 1.0 / std  # divide once per channel; multiply inside the kernel

    rows = n * c
    hw = h * w
    itemsize = jnp.dtype(dtype).itemsize

    # ---- tile selection: lane-dense, 8/128-aligned block shapes; ragged edges are
    #      handled by Pallas' masked edge blocks (no wrapper padding).
    lane_tile = int(min(_round_up(hw, _LANE), _LANE_TILE_MAX))
    rows_from_budget = max(
        _SUBLANE,
        (_TILE_TARGET_BYTES // (lane_tile * itemsize)) // _SUBLANE * _SUBLANE,
    )
    row_tile = int(min(rows_from_budget, _ROW_TILE_MAX, _round_up(rows, _SUBLANE)))

    grid = (pl.cdiv(rows, row_tile), pl.cdiv(hw, lane_tile))  # lane axis innermost

    # ---- operands: (rows, hw) image view; (rows, 1) per-row stats (channel of
    #      row r is r % C, so tile the per-channel vectors over the batch).
    img2 = img.reshape(rows, hw)
    mean_rows = jnp.tile(mean, n).reshape(rows, 1)
    inv_std_rows = jnp.tile(inv_std, n).reshape(rows, 1)

    out = pl.pallas_call(
        _normalize_kernel,
        out_shape=jax.ShapeDtypeStruct((rows, hw), dtype),
        grid=grid,
        in_specs=[
            pl.BlockSpec((row_tile, lane_tile), lambda i, j: (i, j)),
            pl.BlockSpec((row_tile, 1), lambda i, j: (i, 0)),
            pl.BlockSpec((row_tile, 1), lambda i, j: (i, 0)),
        ],
        out_specs=pl.BlockSpec((row_tile, lane_tile), lambda i, j: (i, j)),
        compiler_params=pltpu.CompilerParams(
            dimension_semantics=("parallel", "parallel"),
            vmem_limit_bytes=_VMEM_LIMIT_BYTES,
        ),
    )(img2, mean_rows, inv_std_rows)

    return out.reshape(orig_shape)


class Normalization:
    """JAX/Pallas port of the PyTorch Normalization module."""

    def __init__(self, mean, std):
        # mean.clone().detach().view(-1, 1, 1) -> store flat per-channel arrays
        self.mean = jnp.asarray(mean).reshape(-1)
        self.std = jnp.asarray(std).reshape(-1)

    def __call__(self, img):
        return normalize_pallas(img, self.mean, self.std)


if __name__ == "__main__":
    key = jax.random.PRNGKey(0)

    shape = (2, 4, 16, 16)  # NCHW
    img = jax.random.normal(key, shape, dtype=jnp.float32)
    mean = jnp.array([0.485, 0.456, 0.406, 0.500], dtype=jnp.float32)
    std = jnp.array([0.229, 0.224, 0.225, 0.250], dtype=jnp.float32)

    module = Normalization(mean, std)
    out = jax.block_until_ready(module(img))

    # Plain-JAX reference, mirroring the PyTorch broadcast semantics.
    ref = (img - mean.reshape(1, -1, 1, 1)) / std.reshape(1, -1, 1, 1)
    assert out.shape == img.shape
    assert jnp.allclose(out, ref, rtol=1e-5, atol=1e-6)

    print("KERNEL_OK")
</pallas_src>

<mosaic_0001>
module attributes {stable_mosaic.version = 11 : i64} {
  func.func @_normalize_kernel(%arg0: i32, %arg1: i32, %arg2: memref<8x256xf32, #tpu.memory_space<vmem>>, %arg3: memref<8x1xf32, #tpu.memory_space<vmem>>, %arg4: memref<8x1xf32, #tpu.memory_space<vmem>>, %arg5: memref<8x256xf32, #tpu.memory_space<vmem>>) attributes {dimension_semantics = [#tpu.dimension_semantics<parallel>, #tpu.dimension_semantics<parallel>], iteration_bounds = array<i64: 1, 1>, scalar_prefetch = 0 : i64, scratch_operands = 0 : i64, tpu.core_type = #tpu.core_type<tc>, window_params = [{transform_indices = @transform_0, window_bounds = array<i64: 8, 256>}, {transform_indices = @transform_1, window_bounds = array<i64: 8, 1>}, {transform_indices = @transform_2, window_bounds = array<i64: 8, 1>}, {transform_indices = @transform_3, window_bounds = array<i64: 8, 256>}]} {
    %c0 = arith.constant 0 : index
    %c0_0 = arith.constant 0 : index
    %0 = vector.load %arg2[%c0, %c0_0] : memref<8x256xf32, #tpu.memory_space<vmem>>, vector<8x256xf32>
    %c0_1 = arith.constant 0 : index
    %c0_2 = arith.constant 0 : index
    %1 = vector.load %arg3[%c0_1, %c0_2] : memref<8x1xf32, #tpu.memory_space<vmem>>, vector<8x1xf32>
    %2 = vector.broadcast %1 : vector<8x1xf32> to vector<8x256xf32>
    %3 = arith.subf %0, %2 : vector<8x256xf32>
    %c0_3 = arith.constant 0 : index
    %c0_4 = arith.constant 0 : index
    %4 = vector.load %arg4[%c0_3, %c0_4] : memref<8x1xf32, #tpu.memory_space<vmem>>, vector<8x1xf32>
    %5 = vector.broadcast %4 : vector<8x1xf32> to vector<8x256xf32>
    %6 = arith.mulf %3, %5 : vector<8x256xf32>
    %c0_5 = arith.constant 0 : index
    %c0_6 = arith.constant 0 : index
    %7 = vector.load %arg5[%c0_5, %c0_6] : memref<8x256xf32, #tpu.memory_space<vmem>>, vector<8x256xf32>
    tpu.vector_store %arg5[%c0_5, %c0_6], %6 {strides = array<i32>} : memref<8x256xf32, #tpu.memory_space<vmem>>, vector<8x256xf32>,
    return
  }
  func.func @transform_0(%arg0: i32, %arg1: i32) -> (i32, i32) {
    %c0_i32 = arith.constant 0 : i32
    return %arg0, %arg1 : i32, i32
  }
  func.func @transform_1(%arg0: i32, %arg1: i32) -> (i32, i32) {
    %c0_i32 = arith.constant 0 : i32
    %c0_i32_0 = arith.constant 0 : i32
    return %arg0, %c0_i32 : i32, i32
  }
  func.func @transform_2(%arg0: i32, %arg1: i32) -> (i32, i32) {
    %c0_i32 = arith.constant 0 : i32
    %c0_i32_0 = arith.constant 0 : i32
    return %arg0, %c0_i32 : i32, i32
  }
  func.func @transform_3(%arg0: i32, %arg1: i32) -> (i32, i32) {
    %c0_i32 = arith.constant 0 : i32
    return %arg0, %arg1 : i32, i32
  }
}

</mosaic_0001>

<bundles_post_ra>
// kernel: tpu_custom_call.1
= control target key start
LH: loop header
LB: loop body
LE: loop exit
PB: predicated region body
PF: predicated region fallthrough
CT: control target
= control target key end

     0   :  { %v74_v1 = vmov 0   ;;  %s111_s0 = inlined_call_operand.vmem [shape: f32[8,256], index: 0, kind: input, shape index: {}]   ;;  %s112_s1 = inlined_call_operand.vmem [shape: f32[8,1], index: 1, kind: input, shape index: {}]   ;;  %s113_s2 = inlined_call_operand.vmem [shape: f32[8,1], index: 2, kind: input, shape index: {}]   ;;  %s114_s3 = inlined_call_operand.hbm [shape: f32[8,256], index: 3, kind: output, shape index: {}]  }
   0x1   :  { %v17_v0 = vld [vmem:[%s112_s1] sm:$0xff]  ;;  %51 = vset.pattern.permute.xlu0 %v74_v1 }
   0x2   :  { %8 = vsyncpa [#allocation3], 0  ;;  %20 = vperm.xlu0 %51, %v17_v0   ;;  %v25_v2 = vld [vmem:[%s113_s2] sm:$0xff]  ;;  %v16_v5 = vld [vmem:[%s111_s0 + $0x8] sm:$0xff]  ;;  %s75_s20 = smov [#allocation2]  }
   0x3   :  { %v15_v4 = vld [vmem:[%s111_s0] sm:$0xff]  ;;  %s41_s1 = sshll.u32 %s75_s20, 4  ;;  %s42_s1 = int_to_ptr.vmem [resolvable:$true] %s41_s1 }
   0x4   :  { %s52_s2 = scalar_lea.vmem %s42_s1, 256  ;;  %p57_p1 = scmp.lt.s32.totalorder %s42_s1, %s42_s1 }
   0x5   :  { %p53_p0 = scmp.ne.s32.totalorder %s42_s1, %s52_s2  ;;  %p58_p2 = scmp.lt.s32.totalorder %s52_s2, %s52_s2 }
   0x6   :  { %28 = vperm.xlu0 %51, %v25_v2  }
   0x7   :  { %p59_p3 = por %p58_p2, %p57_p1 }
   0x9   :  { %p60_p4 = pnand %p59_p3, %p53_p0 }
  0x7d   :  { %v21_v3 = vpop.permute.xlu0 %20 }
  0x7e   :  { %v23_v6 = vsub.f32 %v15_v4, %v21_v3  ;;  %v24_v7 = vsub.f32 %v16_v5, %v21_v3 }
  0x81   :  { %v29_v8 = vpop.permute.xlu0 %28 }
  0x82   :  { %v31_v9 = vmul.f32 %v29_v8, %v23_v6  ;;  %v32_v10 = vmul.f32 %v29_v8, %v24_v7 }
  0x84   :  { %33 = vst [vmem:[#allocation2] sm:$0xff] %v31_v9  ;;  %34 = vst [vmem:[#allocation2 + $0x8] sm:$0xff] %v32_v10 }
  0x85   :  { %63 = shalt.err (!%p60_p4)
}
  0x86   :  { %44 = dma.vmem_to_hbm [thread:$0]  %s42_s1, 256, %s114_s3, [#allocation3]  }
  0x87   :  { %72 = dma.done.wait [#allocation3], 256  }
  0x88   :  { %73 = vsyncadd [#allocation3], 4294967040 }
  0x89   :  { %48 = vsyncpa [#allocation3], 1 }

</bundles_post_ra>
